<compile_context>
chip_gen: v6e
topology: v6e:2x2x1
jax: 0.10.0
libtpu: 0.0.40
codegen_flags: <defaults>
</compile_context>

<pallas_src>
import functools

import jax
import jax.numpy as jnp
from jax import lax
from jax.experimental import pallas as pl
from jax.experimental.pallas import tpu as pltpu


def _pick_a_chunk(attention_dim):
    """Largest MXU-friendly chunk (<= 256 lanes) that divides the attention dim."""
    if attention_dim <= 256:
        return attention_dim
    for c in (256, 128):
        if attention_dim % c == 0:
            return c
    return attention_dim


def _attention_kernel(enc_ref, att2_ref, we_ref, wf_ref, awe_ref, alpha_ref, *,
                      n_valid, a_chunk):
    Bt, Np, E = enc_ref.shape
    A = we_ref.shape[1]

    # ---- scores: A-chunked encoder projection + fused relu/contract epilogue ----
    # Np is a sublane multiple (8 f32 / 16 bf16), so this flat view is relayout-free.
    enc2d = enc_ref[...].reshape(Bt * Np, E)
    att = jnp.zeros((Bt, Np), jnp.float32)
    for a0 in range(0, A, a_chunk):
        a1 = min(a0 + a_chunk, A)
        # (Bt*Np, E) @ (E, ac) on the MXU, f32 accumulation.
        p = jnp.dot(enc2d, we_ref[:, a0:a1], preferred_element_type=jnp.float32)
        # att2 already contains both biases (be + bd), hoisted in the wrapper.
        p = p.reshape(Bt, Np, a1 - a0) + att2_ref[:, a0:a1][:, None, :]
        h = jnp.maximum(p, 0.0)
        # full_att contraction against the (1, ac) weight row on the VPU/XLU
        # (keeps the MXU free, no lane-sparse (.., 1) matmul output).
        att = att + jnp.sum(h * wf_ref[:, a0:a1], axis=-1)

    # Mask sublane-padded pixels (>= n_valid) so they get alpha == 0 exactly.
    if n_valid < Np:
        lane = lax.broadcasted_iota(jnp.int32, (Bt, Np), 1)
        att = jnp.where(lane < n_valid, att, -jnp.inf)

    # Softmax over the pixel (lane) axis -- lane-dense, no transposes.
    m = jnp.max(att, axis=-1, keepdims=True)
    e = jnp.exp(att - m)
    alpha = e / jnp.sum(e, axis=-1, keepdims=True)                # (Bt, Np) f32
    alpha_ref[...] = alpha

    # Attention-weighted encoding: broadcast-multiply in enc's dtype (halves VALU
    # work on bf16-capable VPUs) + sublane reduce with f32 accumulation.  Padded
    # pixels / batch rows contribute exactly 0 (enc padding is 0, alpha is 0 there).
    # enc is re-read here so its value is not kept live across the matmul loop.
    enc3 = enc_ref[...]
    prod = (enc3 * alpha.astype(enc3.dtype)[:, :, None]).astype(jnp.float32)
    awe_ref[...] = jnp.sum(prod, axis=1)                          # (Bt, E) f32


def _build_attention_call(*, Bt, n_blk, enc_dim, att_dim, b_pad, enc_dtype,
                          n_valid, a_chunk, vmem_limit, single_buffer_weights):
    kernel = functools.partial(_attention_kernel, n_valid=n_valid, a_chunk=a_chunk)

    if single_buffer_weights:
        # Constant-index weights are DMA'd only on step 0; one VMEM buffer is enough.
        we_spec = pl.BlockSpec((enc_dim, att_dim), lambda b: (0, 0),
                               pipeline_mode=pl.Buffered(1))
        wf_spec = pl.BlockSpec((1, att_dim), lambda b: (0, 0),
                               pipeline_mode=pl.Buffered(1))
    else:
        we_spec = pl.BlockSpec((enc_dim, att_dim), lambda b: (0, 0))
        wf_spec = pl.BlockSpec((1, att_dim), lambda b: (0, 0))

    elt = jnp.dtype(enc_dtype).itemsize
    flops = (2 * b_pad * n_blk * enc_dim * att_dim    # encoder projection
             + 4 * b_pad * n_blk * att_dim            # bias/relu/wf epilogue
             + 2 * b_pad * n_blk * enc_dim)           # weighted encoding
    bytes_accessed = (b_pad * n_blk * enc_dim * elt + b_pad * att_dim * 4
                      + enc_dim * att_dim * elt + att_dim * 4
                      + b_pad * enc_dim * 4 + b_pad * n_blk * 4)

    return pl.pallas_call(
        kernel,
        out_shape=(jax.ShapeDtypeStruct((b_pad, enc_dim), jnp.float32),
                   jax.ShapeDtypeStruct((b_pad, n_blk), jnp.float32)),
        grid_spec=pltpu.PrefetchScalarGridSpec(
            num_scalar_prefetch=0,
            grid=(b_pad // Bt,),
            in_specs=[
                pl.BlockSpec((Bt, n_blk, enc_dim), lambda b: (b, 0, 0)),  # enc
                pl.BlockSpec((Bt, att_dim),        lambda b: (b, 0)),     # att2+biases
                we_spec,                                                  # We
                wf_spec,                                                  # wf
            ],
            out_specs=[
                pl.BlockSpec((Bt, enc_dim), lambda b: (b, 0)),            # awe
                pl.BlockSpec((Bt, n_blk),   lambda b: (b, 0)),            # alpha
            ],
        ),
        compiler_params=pltpu.CompilerParams(
            dimension_semantics=("parallel",),
            vmem_limit_bytes=vmem_limit),
        cost_estimate=pl.CostEstimate(flops=int(flops),
                                      transcendentals=int(b_pad * n_blk),
                                      bytes_accessed=int(bytes_accessed)),
    )


def attention_forward(encoder_outputs, decoder_hiddens, params, *,
                      block_b=None, compute_dtype=jnp.bfloat16):
    """encoder_outputs: (B, N, E); decoder_hiddens: (B, D) -> (awe (B,E), alpha (B,N))."""
    we, be, wd, bd, wf, bf = params     # bf is a mathematical no-op for the outputs
    B, N, E = encoder_outputs.shape
    A = we.shape[1]
    cdt = jnp.dtype(compute_dtype)

    # (1) Hoisted decoder projection; fold BOTH linear biases into it
    #     (att1 + att2 = enc@We + dec@Wd + be + bd), removing one kernel input.
    att2 = (decoder_hiddens.astype(jnp.float32) @ wd.astype(jnp.float32)
            + (bd + be).astype(jnp.float32))                      # (B, A)

    # (2) Hardware-aware tile selection / VMEM capacity.
    try:
        vmem_cap = int(pltpu.get_tpu_info().vmem_capacity_bytes)
    except Exception:
        vmem_cap = 64 * 2**20            # conservative (v7x-sized) fallback
    if block_b is None:
        block_b = 16 if vmem_cap >= 96 * 2**20 else 8   # bigger tiles on 128 MiB parts
    if B <= block_b:
        # Split into two >=8-row tiles when B >= 16 so a dual-TC part (v7x) gets
        # at least 2 grid steps on the "parallel" batch axis; otherwise one block.
        Bt = 8 * ((B + 15) // 16) if B >= 16 else B
    else:
        Bt = block_b
    B_pad = ((B + Bt - 1) // Bt) * Bt

    # (3) Pixel axis padded only to the sublane multiple of the compute dtype
    #     (8 for f32, 16 for bf16) -- NOT 128 -- minimizing padded FLOPs and DMA.
    sublane = 16 if cdt.itemsize <= 2 else 8
    N_blk = ((N + sublane - 1) // sublane) * sublane

    # (4) Prepare enc with at most ONE extra pass over HBM: cast+pad fused into a
    #     single expression, skipped entirely when enc already arrives in the
    #     compute dtype with aligned shapes (recommended real-scale convention:
    #     produce bf16, sublane-aligned enc upstream).
    enc = encoder_outputs
    needs_cast = enc.dtype != cdt
    needs_pad = (N_blk != N) or (B_pad != B)
    if needs_cast and needs_pad:
        enc = jnp.pad(enc.astype(cdt), ((0, B_pad - B), (0, N_blk - N), (0, 0)))
    elif needs_cast:
        enc = enc.astype(cdt)
    elif needs_pad:
        enc = jnp.pad(enc, ((0, B_pad - B), (0, N_blk - N), (0, 0)))
    if B_pad != B:
        att2 = jnp.pad(att2, ((0, B_pad - B), (0, 0)))

    we2 = we.astype(cdt)
    wf2 = wf.reshape(1, A).astype(jnp.float32)

    # (5) Explicit VMEM budget from the block sizes, clamped to 85% of physical
    #     per-core VMEM (64 MiB v7x / 128 MiB v5e,v6e) to leave compiler headroom.
    a_chunk = _pick_a_chunk(A)
    elt = cdt.itemsize
    vmem_est = (2 * Bt * N_blk * E * elt            # enc (double-buffered)
                + 2 * Bt * A * 4                    # att2
                + 2 * E * A * elt + 2 * A * 4       # weights (worst case 2 buffers)
                + 2 * (Bt * E + Bt * N_blk) * 4     # outputs
                + 2 * Bt * N_blk * a_chunk * 4      # in-flight att1/h chunk
                + Bt * N_blk * E * 4)               # awe epilogue f32 temp
    vmem_limit = int(min(max(3 * vmem_est // 2, 32 * 2**20), int(0.85 * vmem_cap)))

    call_kwargs = dict(Bt=Bt, n_blk=N_blk, enc_dim=E, att_dim=A, b_pad=B_pad,
                       enc_dtype=cdt, n_valid=N, a_chunk=a_chunk,
                       vmem_limit=vmem_limit)
    try:
        awe_pad, alpha_pad = _build_attention_call(
            single_buffer_weights=True, **call_kwargs)(enc, att2, we2, wf2)
    except Exception:
        # Fallback if this Pallas version rejects pipeline_mode=pl.Buffered(1):
        # identical math, just default double-buffered weights.
        awe_pad, alpha_pad = _build_attention_call(
            single_buffer_weights=False, **call_kwargs)(enc, att2, we2, wf2)

    return awe_pad[:B], alpha_pad[:B, :N]


def reference_forward(encoder_outputs, decoder_hiddens, params):
    we, be, wd, bd, wf, bf = params
    att1 = encoder_outputs @ we + be                       # (B, N, A)
    att2 = decoder_hiddens @ wd + bd                       # (B, A)
    h = jnp.maximum(att1 + att2[:, None, :], 0.0)
    att = jnp.einsum('bna,a->bn', h, wf) + bf[0]
    alpha = jax.nn.softmax(att, axis=1)
    awe = jnp.sum(encoder_outputs * alpha[:, :, None], axis=1)
    return awe, alpha


def init_params(key, encoder_dim, decoder_dim, attention_dim):
    # Deterministic synthetic init (PyTorch-Linear-like uniform ranges).
    ks = jax.random.split(key, 6)
    def lin(k, fan_in, shape):
        bound = 1.0 / jnp.sqrt(fan_in)
        return jax.random.uniform(k, shape, jnp.float32, -bound, bound)
    we = lin(ks[0], encoder_dim, (encoder_dim, attention_dim))
    be = lin(ks[1], encoder_dim, (attention_dim,))
    wd = lin(ks[2], decoder_dim, (decoder_dim, attention_dim))
    bd = lin(ks[3], decoder_dim, (attention_dim,))
    wf = lin(ks[4], attention_dim, (attention_dim,))
    bf = lin(ks[5], attention_dim, (1,))
    return (we, be, wd, bd, wf, bf)


if __name__ == "__main__":
    # Config 1: small shapes consistent with the module (scaled down from
    # 2048/512/512, 14x14=196 pixels); N deliberately not a sublane multiple.
    B, N = 2, 20
    E, D, A = 256, 128, 128

    key = jax.random.PRNGKey(0)
    k_enc, k_dec, k_par, k_cfg2 = jax.random.split(key, 4)
    encoder_outputs = jax.random.normal(k_enc, (B, N, E), jnp.float32)
    decoder_hiddens = jax.random.normal(k_dec, (B, D), jnp.float32)
    params = init_params(k_par, E, D, A)

    awe_r, alpha_r = reference_forward(encoder_outputs, decoder_hiddens, params)

    # f32 path (strict tolerance).
    awe, alpha = attention_forward(encoder_outputs, decoder_hiddens, params,
                                   compute_dtype=jnp.float32)
    awe, alpha = jax.block_until_ready((awe, alpha))
    assert awe.shape == (B, E) and alpha.shape == (B, N)
    assert jnp.allclose(awe, awe_r, atol=1e-4, rtol=1e-4)
    assert jnp.allclose(alpha, alpha_r, atol=1e-5, rtol=1e-5)
    assert jnp.allclose(jnp.sum(alpha, axis=1), 1.0, atol=1e-5)

    # Default bf16 fast path: enc handed over already in bf16 (recommended real-scale
    # convention -> the wrapper adds no cast pass), f32 MXU accumulation.
    enc_bf16 = encoder_outputs.astype(jnp.bfloat16)
    awe16, alpha16 = attention_forward(enc_bf16, decoder_hiddens, params)
    awe16, alpha16 = jax.block_until_ready((awe16, alpha16))
    assert jnp.allclose(awe16, awe_r, atol=2e-2, rtol=2e-2)
    assert jnp.allclose(alpha16, alpha_r, atol=2e-2, rtol=2e-2)

    # Config 2 (f32, strict-ish): exercises multi-step grid, batch padding and the
    # A-chunked score loop (A=384 -> three 128-wide chunks; block_b=8 -> grid of 2).
    B2, N2, E2, D2, A2 = 12, 40, 128, 64, 384
    k2e, k2d, k2p = jax.random.split(k_cfg2, 3)
    enc2 = jax.random.normal(k2e, (B2, N2, E2), jnp.float32)
    dec2 = jax.random.normal(k2d, (B2, D2), jnp.float32)
    params2 = init_params(k2p, E2, D2, A2)
    awe2_r, alpha2_r = reference_forward(enc2, dec2, params2)
    awe2, alpha2 = attention_forward(enc2, dec2, params2,
                                     compute_dtype=jnp.float32, block_b=8)
    awe2, alpha2 = jax.block_until_ready((awe2, alpha2))
    assert awe2.shape == (B2, E2) and alpha2.shape == (B2, N2)
    assert jnp.allclose(awe2, awe2_r, atol=1e-4, rtol=1e-4)
    assert jnp.allclose(alpha2, alpha2_r, atol=1e-4, rtol=1e-4)
    assert jnp.allclose(jnp.sum(alpha2, axis=1), 1.0, atol=1e-5)

    print("KERNEL_OK")
</pallas_src>

<mosaic_0001>
module attributes {stable_mosaic.version = 11 : i64} {
  func.func @_attention_kernel(%arg0: i32, %arg1: memref<2x24x256xf32, #tpu.memory_space<vmem>>, %arg2: memref<2x128xf32, #tpu.memory_space<vmem>>, %arg3: memref<256x128xf32, #tpu.memory_space<vmem>>, %arg4: memref<1x128xf32, #tpu.memory_space<vmem>>, %arg5: memref<2x256xf32, #tpu.memory_space<vmem>>, %arg6: memref<2x24xf32, #tpu.memory_space<vmem>>) attributes {dimension_semantics = [#tpu.dimension_semantics<parallel>], iteration_bounds = array<i64: 1>, scalar_prefetch = 0 : i64, scratch_operands = 0 : i64, tpu.core_type = #tpu.core_type<tc>, window_params = [{transform_indices = @transform_0, window_bounds = array<i64: 2, 24, 256>}, {transform_indices = @transform_1, window_bounds = array<i64: 2, 128>}, {pipeline_mode = #tpu.pipeline_mode<synchronous>, transform_indices = @transform_2, window_bounds = array<i64: 256, 128>}, {pipeline_mode = #tpu.pipeline_mode<synchronous>, transform_indices = @transform_3, window_bounds = array<i64: 1, 128>}, {transform_indices = @transform_4, window_bounds = array<i64: 2, 256>}, {transform_indices = @transform_5, window_bounds = array<i64: 2, 24>}]} {
    %c0 = arith.constant 0 : index
    %c0_0 = arith.constant 0 : index
    %c0_1 = arith.constant 0 : index
    %0 = vector.load %arg1[%c0, %c0_0, %c0_1] : memref<2x24x256xf32, #tpu.memory_space<vmem>>, vector<2x24x256xf32>
    %1 = vector.shape_cast %0 : vector<2x24x256xf32> to vector<48x256xf32>
    %cst = arith.constant 0.000000e+00 : f32
    %2 = vector.broadcast %cst : f32 to vector<2x24xf32>
    %c0_2 = arith.constant 0 : index
    %c0_3 = arith.constant 0 : index
    %3 = vector.load %arg3[%c0_2, %c0_3] : memref<256x128xf32, #tpu.memory_space<vmem>>, vector<256x128xf32>
    %cst_4 = arith.constant dense<0.000000e+00> : vector<48x128xf32>
    %4 = tpu.matmul %1, %3, %cst_4 {dimension_numbers = #tpu.dot_dimension_numbers<[1], [0], [0], [1], [0, 0, 1, 1], [], []>} : vector<48x256xf32>, vector<256x128xf32>, vector<48x128xf32> -> vector<48x128xf32>
    %5 = vector.shape_cast %4 : vector<48x128xf32> to vector<2x24x128xf32>
    %c0_5 = arith.constant 0 : index
    %c0_6 = arith.constant 0 : index
    %6 = vector.load %arg2[%c0_5, %c0_6] : memref<2x128xf32, #tpu.memory_space<vmem>>, vector<2x128xf32>
    %7 = vector.shape_cast %6 : vector<2x128xf32> to vector<2x1x128xf32>
    %8 = vector.broadcast %7 : vector<2x1x128xf32> to vector<2x24x128xf32>
    %9 = arith.addf %5, %8 : vector<2x24x128xf32>
    %cst_7 = arith.constant 0.000000e+00 : f32
    %10 = vector.broadcast %cst_7 : f32 to vector<2x24x128xf32>
    %11 = arith.maximumf %9, %10 : vector<2x24x128xf32>
    %c0_8 = arith.constant 0 : index
    %c0_9 = arith.constant 0 : index
    %12 = vector.load %arg4[%c0_8, %c0_9] : memref<1x128xf32, #tpu.memory_space<vmem>>, vector<1x128xf32>
    %13 = vector.shape_cast %12 : vector<1x128xf32> to vector<1x1x128xf32>
    %14 = vector.broadcast %13 : vector<1x1x128xf32> to vector<2x24x128xf32>
    %15 = arith.mulf %11, %14 : vector<2x24x128xf32>
    %cst_10 = arith.constant dense<0.000000e+00> : vector<2x24xf32>
    %16 = vector.multi_reduction <add>, %15, %cst_10 [2] : vector<2x24x128xf32> to vector<2x24xf32>
    %17 = arith.addf %2, %16 : vector<2x24xf32>
    %18 = tpu.iota {dimensions = array<i32: 1>} : vector<2x24xi32>
    %c20_i32 = arith.constant 20 : i32
    %19 = vector.broadcast %c20_i32 : i32 to vector<2x24xi32>
    %20 = arith.cmpi slt, %18, %19 : vector<2x24xi32>
    %cst_11 = arith.constant 0xFF800000 : f32
    %21 = vector.broadcast %cst_11 : f32 to vector<2x24xf32>
    %22 = arith.select %20, %17, %21 : vector<2x24xi1>, vector<2x24xf32>
    %cst_12 = arith.constant dense<0xFF800000> : vector<2xf32>
    %23 = vector.multi_reduction <maximumf>, %22, %cst_12 [1] : vector<2x24xf32> to vector<2xf32>
    %24 = vector.shape_cast %23 : vector<2xf32> to vector<2x1xf32>
    %25 = vector.broadcast %24 : vector<2x1xf32> to vector<2x24xf32>
    %26 = arith.subf %22, %25 : vector<2x24xf32>
    %27 = math.exp %26 : vector<2x24xf32>
    %cst_13 = arith.constant dense<0.000000e+00> : vector<2xf32>
    %28 = vector.multi_reduction <add>, %27, %cst_13 [1] : vector<2x24xf32> to vector<2xf32>
    %29 = vector.shape_cast %28 : vector<2xf32> to vector<2x1xf32>
    %30 = vector.broadcast %29 : vector<2x1xf32> to vector<2x24xf32>
    %31 = arith.divf %27, %30 : vector<2x24xf32>
    %c0_14 = arith.constant 0 : index
    %c0_15 = arith.constant 0 : index
    %32 = vector.load %arg6[%c0_14, %c0_15] : memref<2x24xf32, #tpu.memory_space<vmem>>, vector<2x24xf32>
    tpu.vector_store %arg6[%c0_14, %c0_15], %31 {strides = array<i32>} : memref<2x24xf32, #tpu.memory_space<vmem>>, vector<2x24xf32>,
    %c0_16 = arith.constant 0 : index
    %c0_17 = arith.constant 0 : index
    %c0_18 = arith.constant 0 : index
    %33 = vector.load %arg1[%c0_16, %c0_17, %c0_18] : memref<2x24x256xf32, #tpu.memory_space<vmem>>, vector<2x24x256xf32>
    %34 = vector.shape_cast %31 : vector<2x24xf32> to vector<2x24x1xf32>
    %35 = vector.broadcast %34 : vector<2x24x1xf32> to vector<2x24x256xf32>
    %36 = arith.mulf %33, %35 : vector<2x24x256xf32>
    %cst_19 = arith.constant dense<0.000000e+00> : vector<2x256xf32>
    %37 = vector.multi_reduction <add>, %36, %cst_19 [1] : vector<2x24x256xf32> to vector<2x256xf32>
    %c0_20 = arith.constant 0 : index
    %c0_21 = arith.constant 0 : index
    %38 = vector.load %arg5[%c0_20, %c0_21] : memref<2x256xf32, #tpu.memory_space<vmem>>, vector<2x256xf32>
    tpu.vector_store %arg5[%c0_20, %c0_21], %37 {strides = array<i32>} : memref<2x256xf32, #tpu.memory_space<vmem>>, vector<2x256xf32>,
    return
  }
  func.func @transform_0(%arg0: i32) -> (i32, i32, i32) {
    %c0_i32 = arith.constant 0 : i32
    %c0_i32_0 = arith.constant 0 : i32
    %c0_i32_1 = arith.constant 0 : i32
    return %arg0, %c0_i32, %c0_i32_0 : i32, i32, i32
  }
  func.func @transform_1(%arg0: i32) -> (i32, i32) {
    %c0_i32 = arith.constant 0 : i32
    %c0_i32_0 = arith.constant 0 : i32
    return %arg0, %c0_i32 : i32, i32
  }
  func.func @transform_2(%arg0: i32) -> (i32, i32) {
    %c0_i32 = arith.constant 0 : i32
    %c0_i32_0 = arith.constant 0 : i32
    %c0_i32_1 = arith.constant 0 : i32
    return %c0_i32, %c0_i32_0 : i32, i32
  }
  func.func @transform_3(%arg0: i32) -> (i32, i32) {
    %c0_i32 = arith.constant 0 : i32
    %c0_i32_0 = arith.constant 0 : i32
    %c0_i32_1 = arith.constant 0 : i32
    return %c0_i32, %c0_i32_0 : i32, i32
  }
  func.func @transform_4(%arg0: i32) -> (i32, i32) {
    %c0_i32 = arith.constant 0 : i32
    %c0_i32_0 = arith.constant 0 : i32
    return %arg0, %c0_i32 : i32, i32
  }
  func.func @transform_5(%arg0: i32) -> (i32, i32) {
    %c0_i32 = arith.constant 0 : i32
    %c0_i32_0 = arith.constant 0 : i32
    return %arg0, %c0_i32 : i32, i32
  }
}

module attributes {stable_mosaic.version = 11 : i64} {
  func.func @_attention_kernel(%arg0: i32, %arg1: memref<2x24x256xf32, #tpu.memory_space<vmem>>, %arg2: memref<2x128xf32, #tpu.memory_space<vmem>>, %arg3: memref<256x128xf32, #tpu.memory_space<vmem>>, %arg4: memref<1x128xf32, #tpu.memory_space<vmem>>, %arg5: memref<2x256xf32, #tpu.memory_space<vmem>>, %arg6: memref<2x24xf32, #tpu.memory_space<vmem>>) attributes {dimension_semantics = [#tpu.dimension_semantics<parallel>], iteration_bounds = array<i64: 1>, scalar_prefetch = 0 : i64, scratch_operands = 0 : i64, tpu.core_type = #tpu.core_type<tc>, window_params = [{transform_indices = @transform_0, window_bounds = array<i64: 2, 24, 256>}, {transform_indices = @transform_1, window_bounds = array<i64: 2, 128>}, {pipeline_mode = #tpu.pipeline_mode<synchronous>, transform_indices = @transform_2, window_bounds = array<i64: 256, 128>}, {pipeline_mode = #tpu.pipeline_mode<synchronous>, transform_indices = @transform_3, window_bounds = array<i64: 1, 128>}, {transform_indices = @transform_4, window_bounds = array<i64: 2, 256>}, {transform_indices = @transform_5, window_bounds = array<i64: 2, 24>}]} {
    %c0 = arith.constant 0 : index
    %c0_0 = arith.constant 0 : index
    %c0_1 = arith.constant 0 : index
    %0 = vector.load %arg1[%c0, %c0_0, %c0_1] : memref<2x24x256xf32, #tpu.memory_space<vmem>>, vector<2x24x256xf32>
    %1 = vector.shape_cast %0 : vector<2x24x256xf32> to vector<48x256xf32>
    %cst = arith.constant 0.000000e+00 : f32
    %2 = vector.broadcast %cst : f32 to vector<2x24xf32>
    %c0_2 = arith.constant 0 : index
    %c0_3 = arith.constant 0 : index
    %3 = vector.load %arg3[%c0_2, %c0_3] : memref<256x128xf32, #tpu.memory_space<vmem>>, vector<256x128xf32>
    %cst_4 = arith.constant dense<0.000000e+00> : vector<48x128xf32>
    %4 = tpu.matmul %1, %3, %cst_4 {dimension_numbers = #tpu.dot_dimension_numbers<[1], [0], [0], [1], [0, 0, 1, 1], [], []>} : vector<48x256xf32>, vector<256x128xf32>, vector<48x128xf32> -> vector<48x128xf32>
    %5 = vector.shape_cast %4 : vector<48x128xf32> to vector<2x24x128xf32>
    %c0_5 = arith.constant 0 : index
    %c0_6 = arith.constant 0 : index
    %6 = vector.load %arg2[%c0_5, %c0_6] : memref<2x128xf32, #tpu.memory_space<vmem>>, vector<2x128xf32>
    %7 = vector.shape_cast %6 : vector<2x128xf32> to vector<2x1x128xf32>
    %8 = vector.broadcast %7 : vector<2x1x128xf32> to vector<2x24x128xf32>
    %9 = arith.addf %5, %8 : vector<2x24x128xf32>
    %cst_7 = arith.constant 0.000000e+00 : f32
    %10 = vector.broadcast %cst_7 : f32 to vector<2x24x128xf32>
    %11 = arith.maximumf %9, %10 : vector<2x24x128xf32>
    %c0_8 = arith.constant 0 : index
    %c0_9 = arith.constant 0 : index
    %12 = vector.load %arg4[%c0_8, %c0_9] : memref<1x128xf32, #tpu.memory_space<vmem>>, vector<1x128xf32>
    %13 = vector.shape_cast %12 : vector<1x128xf32> to vector<1x1x128xf32>
    %14 = vector.broadcast %13 : vector<1x1x128xf32> to vector<2x24x128xf32>
    %15 = arith.mulf %11, %14 : vector<2x24x128xf32>
    %cst_10 = arith.constant dense<0.000000e+00> : vector<2x24xf32>
    %16 = vector.multi_reduction <add>, %15, %cst_10 [2] : vector<2x24x128xf32> to vector<2x24xf32>
    %17 = arith.addf %2, %16 : vector<2x24xf32>
    %18 = tpu.iota {dimensions = array<i32: 1>} : vector<2x24xi32>
    %c20_i32 = arith.constant 20 : i32
    %19 = vector.broadcast %c20_i32 : i32 to vector<2x24xi32>
    %20 = arith.cmpi slt, %18, %19 : vector<2x24xi32>
    %cst_11 = arith.constant 0xFF800000 : f32
    %21 = vector.broadcast %cst_11 : f32 to vector<2x24xf32>
    %22 = arith.select %20, %17, %21 : vector<2x24xi1>, vector<2x24xf32>
    %cst_12 = arith.constant dense<0xFF800000> : vector<2xf32>
    %23 = vector.multi_reduction <maximumf>, %22, %cst_12 [1] : vector<2x24xf32> to vector<2xf32>
    %24 = vector.shape_cast %23 : vector<2xf32> to vector<2x1xf32>
    %25 = vector.broadcast %24 : vector<2x1xf32> to vector<2x24xf32>
    %26 = arith.subf %22, %25 : vector<2x24xf32>
    %27 = math.exp %26 : vector<2x24xf32>
    %cst_13 = arith.constant dense<0.000000e+00> : vector<2xf32>
    %28 = vector.multi_reduction <add>, %27, %cst_13 [1] : vector<2x24xf32> to vector<2xf32>
    %29 = vector.shape_cast %28 : vector<2xf32> to vector<2x1xf32>
    %30 = vector.broadcast %29 : vector<2x1xf32> to vector<2x24xf32>
    %31 = arith.divf %27, %30 : vector<2x24xf32>
    %c0_14 = arith.constant 0 : index
    %c0_15 = arith.constant 0 : index
    %32 = vector.load %arg6[%c0_14, %c0_15] : memref<2x24xf32, #tpu.memory_space<vmem>>, vector<2x24xf32>
    tpu.vector_store %arg6[%c0_14, %c0_15], %31 {strides = array<i32>} : memref<2x24xf32, #tpu.memory_space<vmem>>, vector<2x24xf32>,
    %c0_16 = arith.constant 0 : index
    %c0_17 = arith.constant 0 : index
    %c0_18 = arith.constant 0 : index
    %33 = vector.load %arg1[%c0_16, %c0_17, %c0_18] : memref<2x24x256xf32, #tpu.memory_space<vmem>>, vector<2x24x256xf32>
    %34 = vector.shape_cast %31 : vector<2x24xf32> to vector<2x24x1xf32>
    %35 = vector.broadcast %34 : vector<2x24x1xf32> to vector<2x24x256xf32>
    %36 = arith.mulf %33, %35 : vector<2x24x256xf32>
    %cst_19 = arith.constant dense<0.000000e+00> : vector<2x256xf32>
    %37 = vector.multi_reduction <add>, %36, %cst_19 [1] : vector<2x24x256xf32> to vector<2x256xf32>
    %c0_20 = arith.constant 0 : index
    %c0_21 = arith.constant 0 : index
    %38 = vector.load %arg5[%c0_20, %c0_21] : memref<2x256xf32, #tpu.memory_space<vmem>>, vector<2x256xf32>
    tpu.vector_store %arg5[%c0_20, %c0_21], %37 {strides = array<i32>} : memref<2x256xf32, #tpu.memory_space<vmem>>, vector<2x256xf32>,
    return
  }
  func.func @transform_0(%arg0: i32) -> (i32, i32, i32) {
    %c0_i32 = arith.constant 0 : i32
    %c0_i32_0 = arith.constant 0 : i32
    %c0_i32_1 = arith.constant 0 : i32
    return %arg0, %c0_i32, %c0_i32_0 : i32, i32, i32
  }
  func.func @transform_1(%arg0: i32) -> (i32, i32) {
    %c0_i32 = arith.constant 0 : i32
    %c0_i32_0 = arith.constant 0 : i32
    return %arg0, %c0_i32 : i32, i32
  }
  func.func @transform_2(%arg0: i32) -> (i32, i32) {
    %c0_i32 = arith.constant 0 : i32
    %c0_i32_0 = arith.constant 0 : i32
    %c0_i32_1 = arith.constant 0 : i32
    return %c0_i32, %c0_i32_0 : i32, i32
  }
  func.func @transform_3(%arg0: i32) -> (i32, i32) {
    %c0_i32 = arith.constant 0 : i32
    %c0_i32_0 = arith.constant 0 : i32
    %c0_i32_1 = arith.constant 0 : i32
    return %c0_i32, %c0_i32_0 : i32, i32
  }
  func.func @transform_4(%arg0: i32) -> (i32, i32) {
    %c0_i32 = arith.constant 0 : i32
    %c0_i32_0 = arith.constant 0 : i32
    return %arg0, %c0_i32 : i32, i32
  }
  func.func @transform_5(%arg0: i32) -> (i32, i32) {
    %c0_i32 = arith.constant 0 : i32
    %c0_i32_0 = arith.constant 0 : i32
    return %arg0, %c0_i32 : i32, i32
  }
}

</mosaic_0001>

<bundles_post_ra>
// kernel: tpu_custom_call.1
= control target key start
LH: loop header
LB: loop body
LE: loop exit
PB: predicated region body
PF: predicated region fallthrough
CT: control target
= control target key end

     0   :  { %11 = vsyncpa [#allocation3], 0  ;;  %s817_s0 = inlined_call_operand.hbm [shape: f32[2,24,256], index: 0, kind: input, shape index: {}]   ;;  %s818_s1 = inlined_call_operand.hbm [shape: f32[2,128], index: 1, kind: input, shape index: {}]   ;;  %s819_s2 = inlined_call_operand.hbm [shape: f32[256,128], index: 2, kind: input, shape index: {}]   ;;  %s820_s3 = inlined_call_operand.vmem [shape: f32[1,128], index: 3, kind: input, shape index: {}]   ;;  %s821_s4 = inlined_call_operand.hbm [shape: f32[2,256], index: 4, kind: output, shape index: {0}]   ;;  %s822_s5 = inlined_call_operand.hbm [shape: f32[2,24], index: 5, kind: output, shape index: {1}]  }
   0x1   :  { %12 = vsyncpa [#allocation6], 0 }
   0x2   :  { %13 = vsyncpa [#allocation4], 0 }
   0x3   :  { %14 = vsyncpa [#allocation10], 0  ;;  %s691_s18 = smov [#allocation5]   ;;  %s692_s20 = smov [#allocation2]  }
   0x4   :  { %s33_s19 = sshll.u32 %s691_s18, 4  ;;  %s20_s21 = sshll.u32 %s692_s20, 4  ;;  %s34_s19 = int_to_ptr.vmem [resolvable:$true] %s33_s19  ;;  %s21_s21 = int_to_ptr.vmem [resolvable:$true] %s20_s21 }
   0x5   :  { %s591_s22 = scalar_lea.vmem %s34_s19, 32  ;;  %p596_p1 = scmp.lt.s32.totalorder %s34_s19, %s34_s19 }
   0x6   :  { %p592_p0 = scmp.ne.s32.totalorder %s34_s19, %s591_s22  ;;  %p597_p2 = scmp.lt.s32.totalorder %s591_s22, %s591_s22 }
   0x8   :  { %p598_p3 = por %p597_p2, %p596_p1 }
   0xa   :  { %p599_p4 = pnand %p598_p3, %p592_p0 }
   0xc   :  { %602 = shalt.err (!%p599_p4)
}
   0xd   :  { %36 = dma.hbm_to_vmem [thread:$0]  %s818_s1, 32, %s34_s19, [#allocation6]  }
   0xe   :  { %s611_s25 = scalar_lea.vmem %s21_s21, 1536  ;;  %p616_p6 = scmp.lt.s32.totalorder %s21_s21, %s21_s21 }
   0xf   :  { %p612_p5 = scmp.ne.s32.totalorder %s21_s21, %s611_s25  ;;  %p617_p7 = scmp.lt.s32.totalorder %s611_s25, %s611_s25 }
  0x11   :  { %p618_p8 = por %p617_p7, %p616_p6 }
  0x13   :  { %p619_p9 = pnand %p618_p8, %p612_p5 }
  0x15   :  { %622 = shalt.err (!%p619_p9)
}
  0x16   :  { %s693_s26 = smov 256   ;;  %s694_s27 = smov 16  }
  0x17   :  { %26 = dma.hbm_to_vmem [thread:$0]  %s817_s0, 1536, %s21_s21, [#allocation3], %s693_s26, %s693_s26, %s694_s27  }
  0x18   :  { %s695_s30 = smov [#allocation7]  }
  0x19   :  { %s42_s6 = sshll.u32 %s695_s30, 4  ;;  %s43_s6 = int_to_ptr.vmem [resolvable:$true] %s42_s6 }
  0x1a   :  { %s631_s7 = scalar_lea.vmem %s43_s6, 4096  ;;  %p636_p11 = scmp.lt.s32.totalorder %s43_s6, %s43_s6 }
  0x1b   :  { %p632_p10 = scmp.ne.s32.totalorder %s43_s6, %s631_s7  ;;  %p637_p12 = scmp.lt.s32.totalorder %s631_s7, %s631_s7 }
  0x1d   :  { %p638_p13 = por %p637_p12, %p636_p11 }
  0x1f   :  { %p639_p0 = pnand %p638_p13, %p632_p10 }
  0x21   :  { %642 = shalt.err (!%p639_p0)
}
  0x22   :  { %s696_s1 = smov 128   ;;  %s697_s8 = smov 8  }
  0x23   :  { %48 = dma.hbm_to_vmem [thread:$0]  %s819_s2, 4096, %s43_s6, [#allocation6], %s696_s1, %s696_s1, %s697_s8  }
  0x24   :  { %683 = dma.done.wait [#allocation3], 1536  }
  0x25   :  { %684 = vsyncadd [#allocation3], 4294965760 }
  0x26   :  { %685 = dma.done.wait [#allocation6], 4128  }
  0x27   :  { %686 = vsyncadd [#allocation6], 4294963168  ;;  %v103_v0 = vld [vmem:[#allocation7 + $0xf8] sm:$0xff]  ;;  %v102_v2 = vld [vmem:[#allocation7 + $0xf0] sm:$0xff]  ;;  %v698_v44 = vmov 1966171168   ;;  %v212_v46 = vlaneseq }
  0x28   :  { %v87_v1 = vld [vmem:[#allocation7 + $0x78] sm:$0xff]  ;;  %486 = vmatprep.subr.mxu0 %v103_v0  ;;  %536 = vmatprep.subr.mxu1 %v103_v0  ;;  %v86_v3 = vld [vmem:[#allocation7 + $0x70] sm:$0xff]  ;;  %v101_v4 = vld [vmem:[#allocation7 + $0xe8] sm:$0xff]  ;;  %v210_v45 = vunpack.c.l.s4 %v698_v44  ;;  %vm294_vm0 = vcmask 130112   ;;  %vm301_vm1 = vcmask 195712   ;;  %vm317_vm2 = vcmask 1041409  }
  0x29   :  { %487 = vmatpush3.msra.mxu0 %v87_v1  ;;  %552 = vmatpush3.msra.mxu1 %v87_v1  ;;  %v85_v5 = vld [vmem:[#allocation7 + $0x68] sm:$0xff]  ;;  %v100_v6 = vld [vmem:[#allocation7 + $0xe0] sm:$0xff]  ;;  %v99_v8 = vld [vmem:[#allocation7 + $0xd8] sm:$0xff]  ;;  %v777_v48 = vshrl.u32 %v212_v46, 7  ;;  %vm321_vm4 = vcmask 189440  }
  0x2a   :  { %488 = vmatprep.subr.mxu0 %v102_v2  ;;  %537 = vmatprep.subr.mxu1 %v102_v2  ;;  %v84_v7 = vld [vmem:[#allocation7 + $0x60] sm:$0xff]  ;;  %v83_v9 = vld [vmem:[#allocation7 + $0x58] sm:$0xff]  ;;  %v98_v10 = vld [vmem:[#allocation7 + $0xd0] sm:$0xff]  ;;  %v211_v47 = vunpack.c.0.s8 %v210_v45 }
  0x2b   :  { %489 = vmatpush3.msra.mxu0 %v86_v3  ;;  %553 = vmatpush3.msra.mxu1 %v86_v3  ;;  %v82_v11 = vld [vmem:[#allocation7 + $0x50] sm:$0xff]  ;;  %v97_v12 = vld [vmem:[#allocation7 + $0xc8] sm:$0xff]  ;;  %v96_v14 = vld [vmem:[#allocation7 + $0xc0] sm:$0xff]  ;;  %v781_v53 = vsub.s32 0, %v777_v48 }
  0x2c   :  { %490 = vmatprep.subr.mxu0 %v101_v4  ;;  %538 = vmatprep.subr.mxu1 %v101_v4  ;;  %v81_v13 = vld [vmem:[#allocation7 + $0x48] sm:$0xff]  ;;  %v80_v15 = vld [vmem:[#allocation7 + $0x40] sm:$0xff]  ;;  %v95_v16 = vld [vmem:[#allocation7 + $0xb8] sm:$0xff]  ;;  %v214_v50 = vsub.s32 %v211_v47, %v777_v48 }
  0x2d   :  { %491 = vmatpush3.msra.mxu0 %v85_v5  ;;  %554 = vmatpush3.msra.mxu1 %v85_v5  ;;  %v79_v17 = vld [vmem:[#allocation7 + $0x38] sm:$0xff]  ;;  %v94_v18 = vld [vmem:[#allocation7 + $0xb0] sm:$0xff]  ;;  %v93_v20 = vld [vmem:[#allocation7 + $0xa8] sm:$0xff] }
  0x2e   :  { %492 = vmatprep.subr.mxu0 %v100_v6  ;;  %539 = vmatprep.subr.mxu1 %v100_v6  ;;  %v78_v19 = vld [vmem:[#allocation7 + $0x30] sm:$0xff]  ;;  %v77_v21 = vld [vmem:[#allocation7 + $0x28] sm:$0xff]  ;;  %v92_v22 = vld [vmem:[#allocation7 + $0xa0] sm:$0xff] }
  0x2f   :  { %493 = vmatpush3.msra.mxu0 %v84_v7  ;;  %555 = vmatpush3.msra.mxu1 %v84_v7  ;;  %v76_v23 = vld [vmem:[#allocation7 + $0x20] sm:$0xff]  ;;  %v91_v24 = vld [vmem:[#allocation7 + $0x98] sm:$0xff]  ;;  %v90_v26 = vld [vmem:[#allocation7 + $0x90] sm:$0xff] }
  0x30   :  { %494 = vmatprep.subr.mxu0 %v99_v8  ;;  %540 = vmatprep.subr.mxu1 %v99_v8  ;;  %v75_v25 = vld [vmem:[#allocation7 + $0x18] sm:$0xff]  ;;  %v74_v27 = vld [vmem:[#allocation7 + $0x10] sm:$0xff]  ;;  %v89_v28 = vld [vmem:[#allocation7 + $0x88] sm:$0xff] }
  0x31   :  { %495 = vmatpush3.msra.mxu0 %v83_v9  ;;  %556 = vmatpush3.msra.mxu1 %v83_v9  ;;  %v73_v29 = vld [vmem:[#allocation7 + $0x8] sm:$0xff]  ;;  %v88_v30 = vld [vmem:[#allocation7 + $0x80] sm:$0xff]  ;;  %v743_v33 = vld [vmem:[#allocation2 + $0x38] sm:$0xff] }
  0x32   :  { %496 = vmatprep.subr.mxu0 %v98_v10  ;;  %541 = vmatprep.subr.mxu1 %v98_v10  ;;  %v72_v31 = vld [vmem:[#allocation7] sm:$0xff]  ;;  %v747_v35 = vld [vmem:[#allocation2 + $0x30] sm:$0xff]  ;;  %v749_v36 = vld [vmem:[#allocation2 + $0x18] sm:$0xff] }
  0x33   :  { %497 = vmatpush3.msra.mxu0 %v82_v11  ;;  %557 = vmatpush3.msra.mxu1 %v82_v11  ;;  %v741_v32 = vld [vmem:[#allocation2 + $0x8] sm:$0xff]  ;;  %v745_v34 = vld [vmem:[#allocation2] sm:$0xff]  ;;  %v759_v38 = vld [vmem:[#allocation2 + $0x10] sm:$0xff] }
  0x34   :  { %498 = vmatprep.subr.mxu0 %v97_v12  ;;  %542 = vmatprep.subr.mxu1 %v97_v12  ;;  %v751_v37 = vld [vmem:[#allocation2 + $0x48] sm:$0xff]  ;;  %v761_v39 = vld [vmem:[#allocation2 + $0x40] sm:$0xff]  ;;  %v765_v41 = vld [vmem:[#allocation2 + $0x58] sm:$0xff] }
  0x35   :  { %499 = vmatpush3.msra.mxu0 %v81_v13  ;;  %558 = vmatpush3.msra.mxu1 %v81_v13  ;;  %v763_v40 = vld [vmem:[#allocation2 + $0x28] sm:$0xff]  ;;  %v771_v42 = vld [vmem:[#allocation2 + $0x20] sm:$0xff]  ;;  %v773_v43 = vld [vmem:[#allocation2 + $0x50] sm:$0xff] }
  0x36   :  { %500 = vmatprep.subr.mxu0 %v96_v14  ;;  %543 = vmatprep.subr.mxu1 %v96_v14  ;;  %v484_v49 = vld.sshfl [vmem:[#allocation5] sm:$0x11 pattern:$0x75316420] }
  0x37   :  { %501 = vmatpush3.msra.mxu0 %v80_v15  ;;  %559 = vmatpush3.msra.mxu1 %v80_v15  ;;  %v208_v51 = vcombine.high %v484_v49, %v484_v49  ;;  %v215_v52 = vrot.slane %v484_v49, %v214_v50  ;;  %v485_v5 = vld [vmem:[%s820_s3] ss:$0 sm:$0xff]  ;;  %s699_s3 = smov [#allocation9]  }
  0x38   :  { %502 = vmatprep.subr.mxu0 %v95_v16  ;;  %544 = vmatprep.subr.mxu1 %v95_v16  ;;  %s470_s11 = sshll.u32 %s699_s3, 4  ;;  %s471_s11 = int_to_ptr.vmem [resolvable:$true] %s470_s11 }
  0x39   :  { %503 = vmatpush3.msra.mxu0 %v79_v17  ;;  %560 = vmatpush3.msra.mxu1 %v79_v17  ;;  %v222_v54 = vrot.slane %v208_v51, %v214_v50  ;;  %v226_v57 = vrot.slane %v215_v52, %v781_v53  ;;  %s643_s12 = scalar_lea.vmem %s471_s11, 32  ;;  %p648_p2 = scmp.lt.s32.totalorder %s471_s11, %s471_s11 }
  0x3a   :  { %504 = vmatprep.subr.mxu0 %v94_v18  ;;  %545 = vmatprep.subr.mxu1 %v94_v18  ;;  %p644_p1 = scmp.ne.s32.totalorder %s471_s11, %s643_s12  ;;  %p649_p3 = scmp.lt.s32.totalorder %s643_s12, %s643_s12 }
  0x3b   :  { %505 = vmatpush3.msra.mxu0 %v78_v19  ;;  %561 = vmatpush3.msra.mxu1 %v78_v19  ;;  %v230_v58 = vrot.slane %v222_v54, %v781_v53 }
  0x3c   :  { %506 = vmatprep.subr.mxu0 %v93_v20  ;;  %546 = vmatprep.subr.mxu1 %v93_v20  ;;  %p650_p4 = por %p649_p3, %p648_p2 }
  0x3d   :  { %507 = vmatpush3.msra.mxu0 %v77_v21  ;;  %562 = vmatpush3.msra.mxu1 %v77_v21 }
  0x3e   :  { %508 = vmatprep.subr.mxu0 %v92_v22  ;;  %547 = vmatprep.subr.mxu1 %v92_v22  ;;  %p651_p5 = pnand %p650_p4, %p644_p1 }
  0x3f   :  { %509 = vmatpush3.msra.mxu0 %v76_v23  ;;  %563 = vmatpush3.msra.mxu1 %v76_v23 }
  0x40   :  { %510 = vmatprep.subr.mxu0 %v91_v24  ;;  %548 = vmatprep.subr.mxu1 %v91_v24 }
  0x41   :  { %511 = vmatpush3.msra.mxu0 %v75_v25  ;;  %564 = vmatpush3.msra.mxu1 %v75_v25 }
  0x42   :  { %512 = vmatprep.subr.mxu0 %v90_v26  ;;  %549 = vmatprep.subr.mxu1 %v90_v26 }
  0x43   :  { %513 = vmatpush3.msra.mxu0 %v74_v27  ;;  %565 = vmatpush3.msra.mxu1 %v74_v27 }
  0x44   :  { %514 = vmatprep.subr.mxu0 %v89_v28  ;;  %550 = vmatprep.subr.mxu1 %v89_v28 }
  0x45   :  { %515 = vmatpush3.msra.mxu0 %v73_v29  ;;  %566 = vmatpush3.msra.mxu1 %v73_v29 }
  0x46   :  { %516 = vmatprep.subr.mxu0 %v88_v30  ;;  %551 = vmatprep.subr.mxu1 %v88_v30  ;;  %v277_v30 = vand.u32 127, %v212_v46 }
  0x47   :  { %517 = vmatpush3.msra.mxu0 %v72_v31  ;;  %567 = vmatpush3.msra.mxu1 %v72_v31 }
  0x48   :  { %168 = vmatprep.mubr.f32.mxu0 %v741_v32  ;;  %183 = vmatprep.mubr.f32.mxu1 %v743_v33  ;;  %v289_v31 = vadd.s32 4294967288, %v277_v30  ;;  %v296_v47 = vadd.s32 4294967280, %v277_v30  ;;  %v287_v50 = vsub.s32 %v277_v30, %v777_v48  ;;  %vm278_vm3 = vcmp.lt.s32.totalorder %v277_v30, 20 }
  0x49   :  { %169 = vmatmul.mubr.f32.vlgmr.msra.gmra.mxu0 %v745_v34  ;;  %184 = vmatmul.mubr.f32.vlgmr.msra.gmra.mxu1 %v747_v35 }
  0x4a   :  { %173 = vmatprep.mubr.f32.mxu0 %v749_v36  ;;  %188 = vmatprep.mubr.f32.mxu1 %v751_v37  ;;  %v292_v49 = vsub.s32 %v289_v31, %v777_v48  ;;  %v299_v54 = vsub.s32 %v296_v47, %v777_v48 }
  0x4d   :  { %174 = vmatmul.mubr.f32.gmra.mxu0 %v759_v38  ;;  %189 = vmatmul.mubr.f32.gmra.mxu1 %v761_v39 }
  0x4e   :  { %178 = vmatprep.mubr.f32.mxu0 %v763_v40  ;;  %193 = vmatprep.mubr.f32.mxu1 %v765_v41 }
  0x51   :  { %179 = vmatmul.mubr.f32.gmra.mxu0 %v771_v42  ;;  %194 = vmatmul.mubr.f32.gmra.mxu1 %v773_v43 }
 0x109   :  { %v518_v55 = vpop.f32.mrf.mxu0  ;;  %v527_v56 = vpop.f32.mrf.mxu1 }
 0x10b   :  { %v519_v59 = vpop.f32.mrf.mxu0  ;;  %v528_v60 = vpop.f32.mrf.mxu1 }
 0x10c   :  { %v520_v61 = vadd.f32 %v519_v59, %v518_v55  ;;  %v529_v62 = vadd.f32 %v528_v60, %v527_v56 }
 0x10d   :  { %v521_v63 = vpop.f32.mrf.mxu0  ;;  %v530_v0 = vpop.f32.mrf.mxu1 }
 0x10e   :  { %v236_v1 = vadd.f32 %v529_v62, %v230_v58  ;;  %v233_v2 = vadd.f32 %v520_v61, %v226_v57 }
 0x10f   :  { %v522_v3 = vpop.f32.mrf.mxu0  ;;  %v531_v4 = vpop.f32.mrf.mxu1 }
 0x110   :  { %v523_v6 = vadd.f32 %v522_v3, %v521_v63  ;;  %v532_v7 = vadd.f32 %v531_v4, %v530_v0  ;;  %v242_v8 = vmax.f32 %v236_v1, 0.0  ;;  %v239_v9 = vmax.f32 %v233_v2, 0.0 }
 0x111   :  { %v524_v10 = vpop.f32.mrf.mxu0  ;;  %v533_v11 = vpop.f32.mrf.mxu1 }
 0x112   :  { %v234_v12 = vadd.f32 %v523_v6, %v226_v57  ;;  %v237_v13 = vadd.f32 %v532_v7, %v230_v58  ;;  %v255_v14 = vmul.f32 %v485_v5, %v242_v8  ;;  %v252_v15 = vmul.f32 %v485_v5, %v239_v9 }
 0x113   :  { %v525_v16 = vpop.f32.mrf.mxu0  ;;  %v534_v17 = vpop.f32.mrf.mxu1 }
 0x114   :  { %v240_v18 = vmax.f32 %v234_v12, 0.0  ;;  %v243_v19 = vmax.f32 %v237_v13, 0.0  ;;  %v526_v20 = vadd.f32 %v525_v16, %v524_v10  ;;  %v535_v21 = vadd.f32 %v534_v17, %v533_v11  ;;  %264 = vadd.xlane.f32.xlu1 %v255_v14  ;;  %258 = vadd.xlane.f32.xlu0 %v252_v15 }
 0x115   :  { %v363_v11 = vsub.s32 1, %v777_v48 }
 0x116   :  { %v235_v22 = vadd.f32 %v526_v20, %v226_v57  ;;  %v238_v23 = vadd.f32 %v535_v21, %v230_v58  ;;  %v256_v24 = vmul.f32 %v485_v5, %v243_v19  ;;  %v253_v25 = vmul.f32 %v485_v5, %v240_v18 }
 0x118   :  { %v241_v26 = vmax.f32 %v235_v22, 0.0  ;;  %v244_v27 = vmax.f32 %v238_v23, 0.0  ;;  %266 = vadd.xlane.f32.xlu1 %v256_v24  ;;  %260 = vadd.xlane.f32.xlu0 %v253_v25 }
 0x11a   :  { %v257_v28 = vmul.f32 %v485_v5, %v244_v27  ;;  %v254_v29 = vmul.f32 %v485_v5, %v241_v26 }
 0x11c   :  { %268 = vadd.xlane.f32.xlu1 %v257_v28  ;;  %262 = vadd.xlane.f32.xlu0 %v254_v29 }
 0x19d   :  { %v265_v44 = vpop.xlane.xlu1 %264  ;;  %v259_v45 = vpop.xlane.xlu0 %258 }
 0x19e   :  { %v306_v57 = vrot.slane %v265_v44, %v287_v50  ;;  %v288_v58 = vrot.slane %v259_v45, %v287_v50 }
 0x1a1   :  { %v267_v51 = vpop.xlane.xlu1 %266  ;;  %v261_v52 = vpop.xlane.xlu0 %260 }
 0x1a2   :  { %v310_v55 = vrot.slane %v267_v51, %v292_v49  ;;  %v293_v56 = vrot.slane %v261_v52, %v292_v49 }
 0x1a4   :  { %v311_v62 = vsel %vm294_vm0, %v310_v55, %v306_v57  ;;  %v295_v63 = vsel %vm294_vm0, %v293_v56, %v288_v58 }
 0x1a5   :  { %v269_v59 = vpop.xlane.xlu1 %268  ;;  %v263_v60 = vpop.xlane.xlu0 %262 }
 0x1a6   :  { %v315_v46 = vrot.slane %v269_v59, %v299_v54  ;;  %v300_v61 = vrot.slane %v263_v60, %v299_v54 }
 0x1a8   :  { %v302_v0 = vsel %vm301_vm1, %v300_v61, %v295_v63  ;;  %v316_v1 = vsel %vm301_vm1, %v315_v46, %v311_v62 }
 0x1a9   :  { %v318_v2 = vsel %vm317_vm2, %v316_v1, %v302_v0 }
 0x1aa   :  { %v320_v3 = vsel %vm278_vm3, %v318_v2, -inf }
 0x1ab   :  { %v322_v4 = vsel %vm321_vm4, %v320_v3, -inf }
 0x1ac   :  { %323 = vmax.xlane.f32.xlu0 %v322_v4 }
 0x235   :  { %v324_v5 = vpop.xlane.xlu0 %323 }
 0x236   :  { %v325_v6 = vsub.f32 %v320_v3, %v324_v5 }
 0x238   :  { %v326_v7 = vmul.f32 1.442695, %v325_v6 }
 0x23a   :  { %579 = vpow2.f32 %v326_v7 }
 0x247   :  { %v580_v8 = vpop.eup %579 }
 0x248   :  { %v328_v9 = vsel %vm321_vm4, %v580_v8, 0.0 }
 0x249   :  { %329 = vadd.xlane.f32.xlu1 %v328_v9 }
 0x2d2   :  { %v330_v10 = vpop.xlane.xlu1 %329 }
 0x2d3   :  { %581 = vrcp.f32 %v330_v10 }
 0x2e0   :  { %v582_v12 = vpop.eup %581 }
 0x2e1   :  { %v332_v13 = vmul.f32 %v582_v12, %v580_v8 }
 0x2e3   :  { %v364_v14 = vrot.slane %v332_v13, %v363_v11  ;;  %333 = vst.msk [vmem:[#allocation9] sm:$0x3] %vm321_vm4, %v332_v13  ;;  %v349_v15 = vrot.slane %v332_v13, %v781_v53 }
 0x2e5   :  { %370 = vbcast.lane.b32.xlu1 %v364_v14, 264  ;;  %366 = vbcast.lane.b32.xlu0 %v364_v14, 256 }
 0x2e9   :  { %374 = vbcast.lane.b32.xlu0 %v364_v14, 272  ;;  %351 = vbcast.lane.b32.xlu1 %v349_v15, 256 }
 0x2ed   :  { %355 = vbcast.lane.b32.xlu1 %v349_v15, 264 }
 0x2f1   :  { %359 = vbcast.lane.b32.xlu1 %v349_v15, 272 }
 0x2f2   :  { %654 = shalt.err (!%p651_p5)
}
 0x2f3   :  { %473 = dma.vmem_to_hbm [thread:$0]  %s471_s11, 32, %s822_s5, [#allocation10]   ;;  %v700_v54 = vmov 1983009808   ;;  %vm446_vm5 = vcmask 1043459   ;;  %vm448_vm6 = vcmask 1045509  }
 0x2f4   :  { %v426_v55 = vunpack.c.l.s4 %v700_v54  ;;  %s701_s5 = smov [#allocation8]   ;;  %vm450_vm7 = vcmask 1047559  }
 0x2f5   :  { %s460_s15 = sshll.u32 %s701_s5, 4  ;;  %s461_s15 = int_to_ptr.vmem [resolvable:$true] %s460_s15 }
 0x2f6   :  { %v427_v60 = vunpack.c.0.s8 %v426_v55  ;;  %s663_s16 = scalar_lea.vmem %s461_s15, 64  ;;  %p668_p7 = scmp.lt.s32.totalorder %s461_s15, %s461_s15 }
 0x2f7   :  { %p664_p6 = scmp.ne.s32.totalorder %s461_s15, %s663_s16  ;;  %p669_p8 = scmp.lt.s32.totalorder %s663_s16, %s663_s16 }
 0x2f9   :  { %p670_p9 = por %p669_p8, %p668_p7 }
 0x2fb   :  { %p671_p10 = pnand %p670_p9, %p664_p6 }
 0x357   :  { %v371_v16 = vpop.permute.xlu1 %370  ;;  %v367_v53 = vpop.permute.xlu0 %366 }
 0x358   :  { %v384_v17 = vmul.f32 %v371_v16, %v761_v39  ;;  %v385_v18 = vmul.f32 %v371_v16, %v751_v37  ;;  %v382_v19 = vmul.f32 %v367_v53, %v747_v35  ;;  %v383_v20 = vmul.f32 %v367_v53, %v743_v33 }
 0x35a   :  { %v404_v23 = vadd.f32 %v384_v17, %v382_v19  ;;  %v412_v24 = vadd.f32 %v385_v18, %v383_v20 }
 0x35b   :  { %v375_v21 = vpop.permute.xlu0 %374  ;;  %v352_v22 = vpop.permute.xlu1 %351 }
 0x35c   :  { %v386_v25 = vmul.f32 %v375_v21, %v773_v43  ;;  %v387_v26 = vmul.f32 %v375_v21, %v765_v41  ;;  %v376_v35 = vmul.f32 %v352_v22, %v745_v34  ;;  %v377_v33 = vmul.f32 %v352_v22, %v741_v32 }
 0x35e   :  { %v405_v27 = vadd.f32 %v404_v23, %v386_v25  ;;  %v413_v28 = vadd.f32 %v412_v24, %v387_v26 }
 0x35f   :  { %v356_v29 = vpop.permute.xlu1 %355 }
 0x360   :  { %v406_v30 = vrot.slane %v405_v27, 4  ;;  %v414_v31 = vrot.slane %v413_v28, 4  ;;  %v378_v39 = vmul.f32 %v356_v29, %v759_v38  ;;  %v379_v37 = vmul.f32 %v356_v29, %v749_v36 }
 0x362   :  { %v407_v44 = vadd.f32 %v406_v30, %v405_v27  ;;  %v415_v45 = vadd.f32 %v414_v31, %v413_v28  ;;  %v388_v47 = vadd.f32 %v378_v39, %v376_v35  ;;  %v396_v49 = vadd.f32 %v379_v37, %v377_v33 }
 0x363   :  { %v360_v43 = vpop.permute.xlu1 %359 }
 0x364   :  { %v408_v50 = vrot.slane %v407_v44, 2  ;;  %v416_v41 = vrot.slane %v415_v45, 2  ;;  %v380_v51 = vmul.f32 %v360_v43, %v771_v42  ;;  %v381_v52 = vmul.f32 %v360_v43, %v763_v40 }
 0x365   :  { %v430_v40 = vsub.s32 %v427_v60, %v777_v48 }
 0x366   :  { %v409_v38 = vadd.f32 %v408_v50, %v407_v44  ;;  %v417_v56 = vadd.f32 %v416_v41, %v415_v45  ;;  %v389_v36 = vadd.f32 %v388_v47, %v380_v51  ;;  %v397_v57 = vadd.f32 %v396_v49, %v381_v52 }
 0x368   :  { %v410_v34 = vrot.slane %v409_v38, 1  ;;  %v418_v58 = vrot.slane %v417_v56, 1  ;;  %v390_v32 = vrot.slane %v389_v36, 4  ;;  %v398_v59 = vrot.slane %v397_v57, 4 }
 0x36a   :  { %v411_v46 = vadd.f32 %v410_v34, %v409_v38  ;;  %v419_v61 = vadd.f32 %v418_v58, %v417_v56  ;;  %v391_v62 = vadd.f32 %v390_v32, %v389_v36  ;;  %v399_v63 = vadd.f32 %v398_v59, %v397_v57 }
 0x36c   :  { %v392_v0 = vrot.slane %v391_v62, 2  ;;  %v400_v1 = vrot.slane %v399_v63, 2  ;;  %v432_v42 = vcombine.low %v411_v46, %v419_v61 }
 0x36e   :  { %v393_v2 = vadd.f32 %v392_v0, %v391_v62  ;;  %v401_v3 = vadd.f32 %v400_v1, %v399_v63  ;;  %v439_v8 = vrot.slane %v432_v42, %v430_v40 }
 0x370   :  { %v394_v4 = vrot.slane %v393_v2, 1  ;;  %v402_v5 = vrot.slane %v401_v3, 1  ;;  %v444_v11 = vrot.slane %v439_v8, 7 }
 0x372   :  { %v395_v6 = vadd.f32 %v394_v4, %v393_v2  ;;  %v403_v7 = vadd.f32 %v402_v5, %v401_v3 }
 0x374   :  { %v424_v9 = vcombine.low %v395_v6, %v403_v7 }
 0x376   :  { %v431_v10 = vrot.slane %v424_v9, %v430_v40 }
 0x378   :  { %v445_v12 = vsel %vm317_vm2, %v444_v11, %v431_v10 }
 0x379   :  { %v447_v13 = vsel %vm446_vm5, %v444_v11, %v445_v12 }
 0x37a   :  { %v449_v14 = vsel %vm448_vm6, %v444_v11, %v447_v13 }
 0x37b   :  { %v451_v48 = vsel %vm450_vm7, %v444_v11, %v449_v14 }
 0x37c   :  { %453 = vst [vmem:[#allocation8] sm:$0xf] %v451_v48 }
 0x37d   :  { %674 = shalt.err (!%p671_p10)
}
 0x37e   :  { %463 = dma.vmem_to_hbm [thread:$0]  %s461_s15, 64, %s821_s4, [#allocation4]  }
 0x37f   :  { %687 = dma.done.wait [#allocation4], 64  }
 0x380   :  { %688 = vsyncadd [#allocation4], 4294967232 }
 0x381   :  { %689 = dma.done.wait [#allocation10], 32  }
 0x382   :  { %690 = vsyncadd [#allocation10], 4294967264 }
 0x383   :  { %480 = vsyncpa [#allocation3], 1 }
 0x384   :  { %481 = vsyncpa [#allocation6], 1 }
 0x385   :  { %482 = vsyncpa [#allocation4], 1 }
 0x386   :  { %483 = vsyncpa [#allocation10], 1 }

// kernel: tpu_custom_call.1
= control target key start
LH: loop header
LB: loop body
LE: loop exit
PB: predicated region body
PF: predicated region fallthrough
CT: control target
= control target key end

     0   :  { %11 = vsyncpa [#allocation3], 0  ;;  %s817_s0 = inlined_call_operand.hbm [shape: f32[2,24,256], index: 0, kind: input, shape index: {}]   ;;  %s818_s1 = inlined_call_operand.hbm [shape: f32[2,128], index: 1, kind: input, shape index: {}]   ;;  %s819_s2 = inlined_call_operand.hbm [shape: f32[256,128], index: 2, kind: input, shape index: {}]   ;;  %s820_s3 = inlined_call_operand.vmem [shape: f32[1,128], index: 3, kind: input, shape index: {}]   ;;  %s821_s4 = inlined_call_operand.hbm [shape: f32[2,256], index: 4, kind: output, shape index: {0}]   ;;  %s822_s5 = inlined_call_operand.hbm [shape: f32[2,24], index: 5, kind: output, shape index: {1}]  }
   0x1   :  { %12 = vsyncpa [#allocation6], 0 }
   0x2   :  { %13 = vsyncpa [#allocation4], 0 }
   0x3   :  { %14 = vsyncpa [#allocation10], 0  ;;  %s691_s18 = smov [#allocation5]   ;;  %s692_s20 = smov [#allocation2]  }
   0x4   :  { %s33_s19 = sshll.u32 %s691_s18, 4  ;;  %s20_s21 = sshll.u32 %s692_s20, 4  ;;  %s34_s19 = int_to_ptr.vmem [resolvable:$true] %s33_s19  ;;  %s21_s21 = int_to_ptr.vmem [resolvable:$true] %s20_s21 }
   0x5   :  { %s591_s22 = scalar_lea.vmem %s34_s19, 32  ;;  %p596_p1 = scmp.lt.s32.totalorder %s34_s19, %s34_s19 }
   0x6   :  { %p592_p0 = scmp.ne.s32.totalorder %s34_s19, %s591_s22  ;;  %p597_p2 = scmp.lt.s32.totalorder %s591_s22, %s591_s22 }
   0x8   :  { %p598_p3 = por %p597_p2, %p596_p1 }
   0xa   :  { %p599_p4 = pnand %p598_p3, %p592_p0 }
   0xc   :  { %602 = shalt.err (!%p599_p4)
}
   0xd   :  { %36 = dma.hbm_to_vmem [thread:$0]  %s818_s1, 32, %s34_s19, [#allocation6]  }
   0xe   :  { %s611_s25 = scalar_lea.vmem %s21_s21, 1536  ;;  %p616_p6 = scmp.lt.s32.totalorder %s21_s21, %s21_s21 }
   0xf   :  { %p612_p5 = scmp.ne.s32.totalorder %s21_s21, %s611_s25  ;;  %p617_p7 = scmp.lt.s32.totalorder %s611_s25, %s611_s25 }
  0x11   :  { %p618_p8 = por %p617_p7, %p616_p6 }
  0x13   :  { %p619_p9 = pnand %p618_p8, %p612_p5 }
  0x15   :  { %622 = shalt.err (!%p619_p9)
}
  0x16   :  { %s693_s26 = smov 256   ;;  %s694_s27 = smov 16  }
  0x17   :  { %26 = dma.hbm_to_vmem [thread:$0]  %s817_s0, 1536, %s21_s21, [#allocation3], %s693_s26, %s693_s26, %s694_s27  }
  0x18   :  { %s695_s30 = smov [#allocation7]  }
  0x19   :  { %s42_s6 = sshll.u32 %s695_s30, 4  ;;  %s43_s6 = int_to_ptr.vmem [resolvable:$true] %s42_s6 }
  0x1a   :  { %s631_s7 = scalar_lea.vmem %s43_s6, 4096  ;;  %p636_p11 = scmp.lt.s32.totalorder %s43_s6, %s43_s6 }
  0x1b   :  { %p632_p10 = scmp.ne.s32.totalorder %s43_s6, %s631_s7  ;;  %p637_p12 = scmp.lt.s32.totalorder %s631_s7, %s631_s7 }
  0x1d   :  { %p638_p13 = por %p637_p12, %p636_p11 }
  0x1f   :  { %p639_p0 = pnand %p638_p13, %p632_p10 }
  0x21   :  { %642 = shalt.err (!%p639_p0)
}
  0x22   :  { %s696_s1 = smov 128   ;;  %s697_s8 = smov 8  }
  0x23   :  { %48 = dma.hbm_to_vmem [thread:$0]  %s819_s2, 4096, %s43_s6, [#allocation6], %s696_s1, %s696_s1, %s697_s8  }
  0x24   :  { %683 = dma.done.wait [#allocation3], 1536  }
  0x25   :  { %684 = vsyncadd [#allocation3], 4294965760 }
  0x26   :  { %685 = dma.done.wait [#allocation6], 4128  }
  0x27   :  { %686 = vsyncadd [#allocation6], 4294963168  ;;  %v103_v0 = vld [vmem:[#allocation7 + $0xf8] sm:$0xff]  ;;  %v102_v2 = vld [vmem:[#allocation7 + $0xf0] sm:$0xff]  ;;  %v698_v44 = vmov 1966171168   ;;  %v212_v46 = vlaneseq }
  0x28   :  { %v87_v1 = vld [vmem:[#allocation7 + $0x78] sm:$0xff]  ;;  %486 = vmatprep.subr.mxu0 %v103_v0  ;;  %536 = vmatprep.subr.mxu1 %v103_v0  ;;  %v86_v3 = vld [vmem:[#allocation7 + $0x70] sm:$0xff]  ;;  %v101_v4 = vld [vmem:[#allocation7 + $0xe8] sm:$0xff]  ;;  %v210_v45 = vunpack.c.l.s4 %v698_v44  ;;  %vm294_vm0 = vcmask 130112   ;;  %vm301_vm1 = vcmask 195712   ;;  %vm317_vm2 = vcmask 1041409  }
  0x29   :  { %487 = vmatpush3.msra.mxu0 %v87_v1  ;;  %552 = vmatpush3.msra.mxu1 %v87_v1  ;;  %v85_v5 = vld [vmem:[#allocation7 + $0x68] sm:$0xff]  ;;  %v100_v6 = vld [vmem:[#allocation7 + $0xe0] sm:$0xff]  ;;  %v99_v8 = vld [vmem:[#allocation7 + $0xd8] sm:$0xff]  ;;  %v777_v48 = vshrl.u32 %v212_v46, 7  ;;  %vm321_vm4 = vcmask 189440  }
  0x2a   :  { %488 = vmatprep.subr.mxu0 %v102_v2  ;;  %537 = vmatprep.subr.mxu1 %v102_v2  ;;  %v84_v7 = vld [vmem:[#allocation7 + $0x60] sm:$0xff]  ;;  %v83_v9 = vld [vmem:[#allocation7 + $0x58] sm:$0xff]  ;;  %v98_v10 = vld [vmem:[#allocation7 + $0xd0] sm:$0xff]  ;;  %v211_v47 = vunpack.c.0.s8 %v210_v45 }
  0x2b   :  { %489 = vmatpush3.msra.mxu0 %v86_v3  ;;  %553 = vmatpush3.msra.mxu1 %v86_v3  ;;  %v82_v11 = vld [vmem:[#allocation7 + $0x50] sm:$0xff]  ;;  %v97_v12 = vld [vmem:[#allocation7 + $0xc8] sm:$0xff]  ;;  %v96_v14 = vld [vmem:[#allocation7 + $0xc0] sm:$0xff]  ;;  %v781_v53 = vsub.s32 0, %v777_v48 }
  0x2c   :  { %490 = vmatprep.subr.mxu0 %v101_v4  ;;  %538 = vmatprep.subr.mxu1 %v101_v4  ;;  %v81_v13 = vld [vmem:[#allocation7 + $0x48] sm:$0xff]  ;;  %v80_v15 = vld [vmem:[#allocation7 + $0x40] sm:$0xff]  ;;  %v95_v16 = vld [vmem:[#allocation7 + $0xb8] sm:$0xff]  ;;  %v214_v50 = vsub.s32 %v211_v47, %v777_v48 }
  0x2d   :  { %491 = vmatpush3.msra.mxu0 %v85_v5  ;;  %554 = vmatpush3.msra.mxu1 %v85_v5  ;;  %v79_v17 = vld [vmem:[#allocation7 + $0x38] sm:$0xff]  ;;  %v94_v18 = vld [vmem:[#allocation7 + $0xb0] sm:$0xff]  ;;  %v93_v20 = vld [vmem:[#allocation7 + $0xa8] sm:$0xff] }
  0x2e   :  { %492 = vmatprep.subr.mxu0 %v100_v6  ;;  %539 = vmatprep.subr.mxu1 %v100_v6  ;;  %v78_v19 = vld [vmem:[#allocation7 + $0x30] sm:$0xff]  ;;  %v77_v21 = vld [vmem:[#allocation7 + $0x28] sm:$0xff]  ;;  %v92_v22 = vld [vmem:[#allocation7 + $0xa0] sm:$0xff] }
  0x2f   :  { %493 = vmatpush3.msra.mxu0 %v84_v7  ;;  %555 = vmatpush3.msra.mxu1 %v84_v7  ;;  %v76_v23 = vld [vmem:[#allocation7 + $0x20] sm:$0xff]  ;;  %v91_v24 = vld [vmem:[#allocation7 + $0x98] sm:$0xff]  ;;  %v90_v26 = vld [vmem:[#allocation7 + $0x90] sm:$0xff] }
  0x30   :  { %494 = vmatprep.subr.mxu0 %v99_v8  ;;  %540 = vmatprep.subr.mxu1 %v99_v8  ;;  %v75_v25 = vld [vmem:[#allocation7 + $0x18] sm:$0xff]  ;;  %v74_v27 = vld [vmem:[#allocation7 + $0x10] sm:$0xff]  ;;  %v89_v28 = vld [vmem:[#allocation7 + $0x88] sm:$0xff] }
  0x31   :  { %495 = vmatpush3.msra.mxu0 %v83_v9  ;;  %556 = vmatpush3.msra.mxu1 %v83_v9  ;;  %v73_v29 = vld [vmem:[#allocation7 + $0x8] sm:$0xff]  ;;  %v88_v30 = vld [vmem:[#allocation7 + $0x80] sm:$0xff]  ;;  %v743_v33 = vld [vmem:[#allocation2 + $0x38] sm:$0xff] }
  0x32   :  { %496 = vmatprep.subr.mxu0 %v98_v10  ;;  %541 = vmatprep.subr.mxu1 %v98_v10  ;;  %v72_v31 = vld [vmem:[#allocation7] sm:$0xff]  ;;  %v747_v35 = vld [vmem:[#allocation2 + $0x30] sm:$0xff]  ;;  %v749_v36 = vld [vmem:[#allocation2 + $0x18] sm:$0xff] }
  0x33   :  { %497 = vmatpush3.msra.mxu0 %v82_v11  ;;  %557 = vmatpush3.msra.mxu1 %v82_v11  ;;  %v741_v32 = vld [vmem:[#allocation2 + $0x8] sm:$0xff]  ;;  %v745_v34 = vld [vmem:[#allocation2] sm:$0xff]  ;;  %v759_v38 = vld [vmem:[#allocation2 + $0x10] sm:$0xff] }
  0x34   :  { %498 = vmatprep.subr.mxu0 %v97_v12  ;;  %542 = vmatprep.subr.mxu1 %v97_v12  ;;  %v751_v37 = vld [vmem:[#allocation2 + $0x48] sm:$0xff]  ;;  %v761_v39 = vld [vmem:[#allocation2 + $0x40] sm:$0xff]  ;;  %v765_v41 = vld [vmem:[#allocation2 + $0x58] sm:$0xff] }
  0x35   :  { %499 = vmatpush3.msra.mxu0 %v81_v13  ;;  %558 = vmatpush3.msra.mxu1 %v81_v13  ;;  %v763_v40 = vld [vmem:[#allocation2 + $0x28] sm:$0xff]  ;;  %v771_v42 = vld [vmem:[#allocation2 + $0x20] sm:$0xff]  ;;  %v773_v43 = vld [vmem:[#allocation2 + $0x50] sm:$0xff] }
  0x36   :  { %500 = vmatprep.subr.mxu0 %v96_v14  ;;  %543 = vmatprep.subr.mxu1 %v96_v14  ;;  %v484_v49 = vld.sshfl [vmem:[#allocation5] sm:$0x11 pattern:$0x75316420] }
  0x37   :  { %501 = vmatpush3.msra.mxu0 %v80_v15  ;;  %559 = vmatpush3.msra.mxu1 %v80_v15  ;;  %v208_v51 = vcombine.high %v484_v49, %v484_v49  ;;  %v215_v52 = vrot.slane %v484_v49, %v214_v50  ;;  %v485_v5 = vld [vmem:[%s820_s3] ss:$0 sm:$0xff]  ;;  %s699_s3 = smov [#allocation9]  }
  0x38   :  { %502 = vmatprep.subr.mxu0 %v95_v16  ;;  %544 = vmatprep.subr.mxu1 %v95_v16  ;;  %s470_s11 = sshll.u32 %s699_s3, 4  ;;  %s471_s11 = int_to_ptr.vmem [resolvable:$true] %s470_s11 }
  0x39   :  { %503 = vmatpush3.msra.mxu0 %v79_v17  ;;  %560 = vmatpush3.msra.mxu1 %v79_v17  ;;  %v222_v54 = vrot.slane %v208_v51, %v214_v50  ;;  %v226_v57 = vrot.slane %v215_v52, %v781_v53  ;;  %s643_s12 = scalar_lea.vmem %s471_s11, 32  ;;  %p648_p2 = scmp.lt.s32.totalorder %s471_s11, %s471_s11 }
  0x3a   :  { %504 = vmatprep.subr.mxu0 %v94_v18  ;;  %545 = vmatprep.subr.mxu1 %v94_v18  ;;  %p644_p1 = scmp.ne.s32.totalorder %s471_s11, %s643_s12  ;;  %p649_p3 = scmp.lt.s32.totalorder %s643_s12, %s643_s12 }
  0x3b   :  { %505 = vmatpush3.msra.mxu0 %v78_v19  ;;  %561 = vmatpush3.msra.mxu1 %v78_v19  ;;  %v230_v58 = vrot.slane %v222_v54, %v781_v53 }
  0x3c   :  { %506 = vmatprep.subr.mxu0 %v93_v20  ;;  %546 = vmatprep.subr.mxu1 %v93_v20  ;;  %p650_p4 = por %p649_p3, %p648_p2 }
  0x3d   :  { %507 = vmatpush3.msra.mxu0 %v77_v21  ;;  %562 = vmatpush3.msra.mxu1 %v77_v21 }
  0x3e   :  { %508 = vmatprep.subr.mxu0 %v92_v22  ;;  %547 = vmatprep.subr.mxu1 %v92_v22  ;;  %p651_p5 = pnand %p650_p4, %p644_p1 }
  0x3f   :  { %509 = vmatpush3.msra.mxu0 %v76_v23  ;;  %563 = vmatpush3.msra.mxu1 %v76_v23 }
  0x40   :  { %510 = vmatprep.subr.mxu0 %v91_v24  ;;  %548 = vmatprep.subr.mxu1 %v91_v24 }
  0x41   :  { %511 = vmatpush3.msra.mxu0 %v75_v25  ;;  %564 = vmatpush3.msra.mxu1 %v75_v25 }
  0x42   :  { %512 = vmatprep.subr.mxu0 %v90_v26  ;;  %549 = vmatprep.subr.mxu1 %v90_v26 }
  0x43   :  { %513 = vmatpush3.msra.mxu0 %v74_v27  ;;  %565 = vmatpush3.msra.mxu1 %v74_v27 }
  0x44   :  { %514 = vmatprep.subr.mxu0 %v89_v28  ;;  %550 = vmatprep.subr.mxu1 %v89_v28 }
  0x45   :  { %515 = vmatpush3.msra.mxu0 %v73_v29  ;;  %566 = vmatpush3.msra.mxu1 %v73_v29 }
  0x46   :  { %516 = vmatprep.subr.mxu0 %v88_v30  ;;  %551 = vmatprep.subr.mxu1 %v88_v30  ;;  %v277_v30 = vand.u32 127, %v212_v46 }
  0x47   :  { %517 = vmatpush3.msra.mxu0 %v72_v31  ;;  %567 = vmatpush3.msra.mxu1 %v72_v31 }
  0x48   :  { %168 = vmatprep.mubr.f32.mxu0 %v741_v32  ;;  %183 = vmatprep.mubr.f32.mxu1 %v743_v33  ;;  %v289_v31 = vadd.s32 4294967288, %v277_v30  ;;  %v296_v47 = vadd.s32 4294967280, %v277_v30  ;;  %v287_v50 = vsub.s32 %v277_v30, %v777_v48  ;;  %vm278_vm3 = vcmp.lt.s32.totalorder %v277_v30, 20 }
  0x49   :  { %169 = vmatmul.mubr.f32.vlgmr.msra.gmra.mxu0 %v745_v34  ;;  %184 = vmatmul.mubr.f32.vlgmr.msra.gmra.mxu1 %v747_v35 }
  0x4a   :  { %173 = vmatprep.mubr.f32.mxu0 %v749_v36  ;;  %188 = vmatprep.mubr.f32.mxu1 %v751_v37  ;;  %v292_v49 = vsub.s32 %v289_v31, %v777_v48  ;;  %v299_v54 = vsub.s32 %v296_v47, %v777_v48 }
  0x4d   :  { %174 = vmatmul.mubr.f32.gmra.mxu0 %v759_v38  ;;  %189 = vmatmul.mubr.f32.gmra.mxu1 %v761_v39 }
  0x4e   :  { %178 = vmatprep.mubr.f32.mxu0 %v763_v40  ;;  %193 = vmatprep.mubr.f32.mxu1 %v765_v41 }
  0x51   :  { %179 = vmatmul.mubr.f32.gmra.mxu0 %v771_v42  ;;  %194 = vmatmul.mubr.f32.gmra.mxu1 %v773_v43 }
 0x109   :  { %v518_v55 = vpop.f32.mrf.mxu0  ;;  %v527_v56 = vpop.f32.mrf.mxu1 }
 0x10b   :  { %v519_v59 = vpop.f32.mrf.mxu0  ;;  %v528_v60 = vpop.f32.mrf.mxu1 }
 0x10c   :  { %v520_v61 = vadd.f32 %v519_v59, %v518_v55  ;;  %v529_v62 = vadd.f32 %v528_v60, %v527_v56 }
 0x10d   :  { %v521_v63 = vpop.f32.mrf.mxu0  ;;  %v530_v0 = vpop.f32.mrf.mxu1 }
 0x10e   :  { %v236_v1 = vadd.f32 %v529_v62, %v230_v58  ;;  %v233_v2 = vadd.f32 %v520_v61, %v226_v57 }
 0x10f   :  { %v522_v3 = vpop.f32.mrf.mxu0  ;;  %v531_v4 = vpop.f32.mrf.mxu1 }
 0x110   :  { %v523_v6 = vadd.f32 %v522_v3, %v521_v63  ;;  %v532_v7 = vadd.f32 %v531_v4, %v530_v0  ;;  %v242_v8 = vmax.f32 %v236_v1, 0.0  ;;  %v239_v9 = vmax.f32 %v233_v2, 0.0 }
 0x111   :  { %v524_v10 = vpop.f32.mrf.mxu0  ;;  %v533_v11 = vpop.f32.mrf.mxu1 }
 0x112   :  { %v234_v12 = vadd.f32 %v523_v6, %v226_v57  ;;  %v237_v13 = vadd.f32 %v532_v7, %v230_v58  ;;  %v255_v14 = vmul.f32 %v485_v5, %v242_v8  ;;  %v252_v15 = vmul.f32 %v485_v5, %v239_v9 }
 0x113   :  { %v525_v16 = vpop.f32.mrf.mxu0  ;;  %v534_v17 = vpop.f32.mrf.mxu1 }
 0x114   :  { %v240_v18 = vmax.f32 %v234_v12, 0.0  ;;  %v243_v19 = vmax.f32 %v237_v13, 0.0  ;;  %v526_v20 = vadd.f32 %v525_v16, %v524_v10  ;;  %v535_v21 = vadd.f32 %v534_v17, %v533_v11  ;;  %264 = vadd.xlane.f32.xlu1 %v255_v14  ;;  %258 = vadd.xlane.f32.xlu0 %v252_v15 }
 0x115   :  { %v363_v11 = vsub.s32 1, %v777_v48 }
 0x116   :  { %v235_v22 = vadd.f32 %v526_v20, %v226_v57  ;;  %v238_v23 = vadd.f32 %v535_v21, %v230_v58  ;;  %v256_v24 = vmul.f32 %v485_v5, %v243_v19  ;;  %v253_v25 = vmul.f32 %v485_v5, %v240_v18 }
 0x118   :  { %v241_v26 = vmax.f32 %v235_v22, 0.0  ;;  %v244_v27 = vmax.f32 %v238_v23, 0.0  ;;  %266 = vadd.xlane.f32.xlu1 %v256_v24  ;;  %260 = vadd.xlane.f32.xlu0 %v253_v25 }
 0x11a   :  { %v257_v28 = vmul.f32 %v485_v5, %v244_v27  ;;  %v254_v29 = vmul.f32 %v485_v5, %v241_v26 }
 0x11c   :  { %268 = vadd.xlane.f32.xlu1 %v257_v28  ;;  %262 = vadd.xlane.f32.xlu0 %v254_v29 }
 0x19d   :  { %v265_v44 = vpop.xlane.xlu1 %264  ;;  %v259_v45 = vpop.xlane.xlu0 %258 }
 0x19e   :  { %v306_v57 = vrot.slane %v265_v44, %v287_v50  ;;  %v288_v58 = vrot.slane %v259_v45, %v287_v50 }
 0x1a1   :  { %v267_v51 = vpop.xlane.xlu1 %266  ;;  %v261_v52 = vpop.xlane.xlu0 %260 }
 0x1a2   :  { %v310_v55 = vrot.slane %v267_v51, %v292_v49  ;;  %v293_v56 = vrot.slane %v261_v52, %v292_v49 }
 0x1a4   :  { %v311_v62 = vsel %vm294_vm0, %v310_v55, %v306_v57  ;;  %v295_v63 = vsel %vm294_vm0, %v293_v56, %v288_v58 }
 0x1a5   :  { %v269_v59 = vpop.xlane.xlu1 %268  ;;  %v263_v60 = vpop.xlane.xlu0 %262 }
 0x1a6   :  { %v315_v46 = vrot.slane %v269_v59, %v299_v54  ;;  %v300_v61 = vrot.slane %v263_v60, %v299_v54 }
 0x1a8   :  { %v302_v0 = vsel %vm301_vm1, %v300_v61, %v295_v63  ;;  %v316_v1 = vsel %vm301_vm1, %v315_v46, %v311_v62 }
 0x1a9   :  { %v318_v2 = vsel %vm317_vm2, %v316_v1, %v302_v0 }
 0x1aa   :  { %v320_v3 = vsel %vm278_vm3, %v318_v2, -inf }
 0x1ab   :  { %v322_v4 = vsel %vm321_vm4, %v320_v3, -inf }
 0x1ac   :  { %323 = vmax.xlane.f32.xlu0 %v322_v4 }
 0x235   :  { %v324_v5 = vpop.xlane.xlu0 %323 }
 0x236   :  { %v325_v6 = vsub.f32 %v320_v3, %v324_v5 }
 0x238   :  { %v326_v7 = vmul.f32 1.442695, %v325_v6 }
 0x23a   :  { %579 = vpow2.f32 %v326_v7 }
 0x247   :  { %v580_v8 = vpop.eup %579 }
 0x248   :  { %v328_v9 = vsel %vm321_vm4, %v580_v8, 0.0 }
 0x249   :  { %329 = vadd.xlane.f32.xlu1 %v328_v9 }
 0x2d2   :  { %v330_v10 = vpop.xlane.xlu1 %329 }
 0x2d3   :  { %581 = vrcp.f32 %v330_v10 }
 0x2e0   :  { %v582_v12 = vpop.eup %581 }
 0x2e1   :  { %v332_v13 = vmul.f32 %v582_v12, %v580_v8 }
 0x2e3   :  { %v364_v14 = vrot.slane %v332_v13, %v363_v11  ;;  %333 = vst.msk [vmem:[#allocation9] sm:$0x3] %vm321_vm4, %v332_v13  ;;  %v349_v15 = vrot.slane %v332_v13, %v781_v53 }
 0x2e5   :  { %370 = vbcast.lane.b32.xlu1 %v364_v14, 264  ;;  %366 = vbcast.lane.b32.xlu0 %v364_v14, 256 }
 0x2e9   :  { %374 = vbcast.lane.b32.xlu0 %v364_v14, 272  ;;  %351 = vbcast.lane.b32.xlu1 %v349_v15, 256 }
 0x2ed   :  { %355 = vbcast.lane.b32.xlu1 %v349_v15, 264 }
 0x2f1   :  { %359 = vbcast.lane.b32.xlu1 %v349_v15, 272 }
 0x2f2   :  { %654 = shalt.err (!%p651_p5)
}
 0x2f3   :  { %473 = dma.vmem_to_hbm [thread:$0]  %s471_s11, 32, %s822_s5, [#allocation10]   ;;  %v700_v54 = vmov 1983009808   ;;  %vm446_vm5 = vcmask 1043459   ;;  %vm448_vm6 = vcmask 1045509  }
 0x2f4   :  { %v426_v55 = vunpack.c.l.s4 %v700_v54  ;;  %s701_s5 = smov [#allocation8]   ;;  %vm450_vm7 = vcmask 1047559  }
 0x2f5   :  { %s460_s15 = sshll.u32 %s701_s5, 4  ;;  %s461_s15 = int_to_ptr.vmem [resolvable:$true] %s460_s15 }
 0x2f6   :  { %v427_v60 = vunpack.c.0.s8 %v426_v55  ;;  %s663_s16 = scalar_lea.vmem %s461_s15, 64  ;;  %p668_p7 = scmp.lt.s32.totalorder %s461_s15, %s461_s15 }
 0x2f7   :  { %p664_p6 = scmp.ne.s32.totalorder %s461_s15, %s663_s16  ;;  %p669_p8 = scmp.lt.s32.totalorder %s663_s16, %s663_s16 }
 0x2f9   :  { %p670_p9 = por %p669_p8, %p668_p7 }
 0x2fb   :  { %p671_p10 = pnand %p670_p9, %p664_p6 }
 0x357   :  { %v371_v16 = vpop.permute.xlu1 %370  ;;  %v367_v53 = vpop.permute.xlu0 %366 }
 0x358   :  { %v384_v17 = vmul.f32 %v371_v16, %v761_v39  ;;  %v385_v18 = vmul.f32 %v371_v16, %v751_v37  ;;  %v382_v19 = vmul.f32 %v367_v53, %v747_v35  ;;  %v383_v20 = vmul.f32 %v367_v53, %v743_v33 }
 0x35a   :  { %v404_v23 = vadd.f32 %v384_v17, %v382_v19  ;;  %v412_v24 = vadd.f32 %v385_v18, %v383_v20 }
 0x35b   :  { %v375_v21 = vpop.permute.xlu0 %374  ;;  %v352_v22 = vpop.permute.xlu1 %351 }
 0x35c   :  { %v386_v25 = vmul.f32 %v375_v21, %v773_v43  ;;  %v387_v26 = vmul.f32 %v375_v21, %v765_v41  ;;  %v376_v35 = vmul.f32 %v352_v22, %v745_v34  ;;  %v377_v33 = vmul.f32 %v352_v22, %v741_v32 }
 0x35e   :  { %v405_v27 = vadd.f32 %v404_v23, %v386_v25  ;;  %v413_v28 = vadd.f32 %v412_v24, %v387_v26 }
 0x35f   :  { %v356_v29 = vpop.permute.xlu1 %355 }
 0x360   :  { %v406_v30 = vrot.slane %v405_v27, 4  ;;  %v414_v31 = vrot.slane %v413_v28, 4  ;;  %v378_v39 = vmul.f32 %v356_v29, %v759_v38  ;;  %v379_v37 = vmul.f32 %v356_v29, %v749_v36 }
 0x362   :  { %v407_v44 = vadd.f32 %v406_v30, %v405_v27  ;;  %v415_v45 = vadd.f32 %v414_v31, %v413_v28  ;;  %v388_v47 = vadd.f32 %v378_v39, %v376_v35  ;;  %v396_v49 = vadd.f32 %v379_v37, %v377_v33 }
 0x363   :  { %v360_v43 = vpop.permute.xlu1 %359 }
 0x364   :  { %v408_v50 = vrot.slane %v407_v44, 2  ;;  %v416_v41 = vrot.slane %v415_v45, 2  ;;  %v380_v51 = vmul.f32 %v360_v43, %v771_v42  ;;  %v381_v52 = vmul.f32 %v360_v43, %v763_v40 }
 0x365   :  { %v430_v40 = vsub.s32 %v427_v60, %v777_v48 }
 0x366   :  { %v409_v38 = vadd.f32 %v408_v50, %v407_v44  ;;  %v417_v56 = vadd.f32 %v416_v41, %v415_v45  ;;  %v389_v36 = vadd.f32 %v388_v47, %v380_v51  ;;  %v397_v57 = vadd.f32 %v396_v49, %v381_v52 }
 0x368   :  { %v410_v34 = vrot.slane %v409_v38, 1  ;;  %v418_v58 = vrot.slane %v417_v56, 1  ;;  %v390_v32 = vrot.slane %v389_v36, 4  ;;  %v398_v59 = vrot.slane %v397_v57, 4 }
 0x36a   :  { %v411_v46 = vadd.f32 %v410_v34, %v409_v38  ;;  %v419_v61 = vadd.f32 %v418_v58, %v417_v56  ;;  %v391_v62 = vadd.f32 %v390_v32, %v389_v36  ;;  %v399_v63 = vadd.f32 %v398_v59, %v397_v57 }
 0x36c   :  { %v392_v0 = vrot.slane %v391_v62, 2  ;;  %v400_v1 = vrot.slane %v399_v63, 2  ;;  %v432_v42 = vcombine.low %v411_v46, %v419_v61 }
 0x36e   :  { %v393_v2 = vadd.f32 %v392_v0, %v391_v62  ;;  %v401_v3 = vadd.f32 %v400_v1, %v399_v63  ;;  %v439_v8 = vrot.slane %v432_v42, %v430_v40 }
 0x370   :  { %v394_v4 = vrot.slane %v393_v2, 1  ;;  %v402_v5 = vrot.slane %v401_v3, 1  ;;  %v444_v11 = vrot.slane %v439_v8, 7 }
 0x372   :  { %v395_v6 = vadd.f32 %v394_v4, %v393_v2  ;;  %v403_v7 = vadd.f32 %v402_v5, %v401_v3 }
 0x374   :  { %v424_v9 = vcombine.low %v395_v6, %v403_v7 }
 0x376   :  { %v431_v10 = vrot.slane %v424_v9, %v430_v40 }
 0x378   :  { %v445_v12 = vsel %vm317_vm2, %v444_v11, %v431_v10 }
 0x379   :  { %v447_v13 = vsel %vm446_vm5, %v444_v11, %v445_v12 }
 0x37a   :  { %v449_v14 = vsel %vm448_vm6, %v444_v11, %v447_v13 }
 0x37b   :  { %v451_v48 = vsel %vm450_vm7, %v444_v11, %v449_v14 }
 0x37c   :  { %453 = vst [vmem:[#allocation8] sm:$0xf] %v451_v48 }
 0x37d   :  { %674 = shalt.err (!%p671_p10)
}
 0x37e   :  { %463 = dma.vmem_to_hbm [thread:$0]  %s461_s15, 64, %s821_s4, [#allocation4]  }
 0x37f   :  { %687 = dma.done.wait [#allocation4], 64  }
 0x380   :  { %688 = vsyncadd [#allocation4], 4294967232 }
 0x381   :  { %689 = dma.done.wait [#allocation10], 32  }
 0x382   :  { %690 = vsyncadd [#allocation10], 4294967264 }
 0x383   :  { %480 = vsyncpa [#allocation3], 1 }
 0x384   :  { %481 = vsyncpa [#allocation6], 1 }
 0x385   :  { %482 = vsyncpa [#allocation4], 1 }
 0x386   :  { %483 = vsyncpa [#allocation10], 1 }

</bundles_post_ra>
